<compile_context>
chip_gen: v5e
topology: v5e:2x2
jax: 0.10.0
libtpu: 0.0.40
codegen_flags: <defaults>
</compile_context>

<pallas_src>
import jax
import jax.numpy as jnp
from jax.experimental import pallas as pl
from jax.experimental.pallas import tpu as pltpu

LANE = 128          # TPU lane width
SUBLANE_BF16 = 16   # bf16 sublane packing (safe row granularity for all dtypes)


def _round_up(x, m):
    return (x + m - 1) // m * m


def _cdiv(a, b):
    return (a + b - 1) // b


def mlp_kernel(x_ref, w1_ref, b1_ref, w2_ref, b2_ref, o_ref):
    # Cast x to bf16 in-kernel (keeps the HBM x stream in the caller's dtype,
    # avoids any wrapper-side copy pass).
    x = x_ref[...].astype(jnp.bfloat16)
    # fc1: bf16 MXU matmul, f32 accumulation.
    h = jnp.dot(x, w1_ref[...], preferred_element_type=jnp.float32)   # (tb, H) f32
    # bias + ReLU in f32 on the VPU.
    h = jnp.maximum(h + b1_ref[...], 0.0)
    # TODO(synk): dropout is identity at inference (eval mode); training-mode
    # masking would use pltpu.prng_seed / pltpu.prng_random_bits + 1/(1-p) scale.
    # fc2: cast the activation back to bf16 for the MXU, accumulate in f32.
    y = jnp.dot(h.astype(jnp.bfloat16), w2_ref[...],
                preferred_element_type=jnp.float32)                   # (tb, D_out) f32
    o_ref[...] = (y + b2_ref[...]).astype(o_ref.dtype)


def mlp_forward(x, w1, b1, w2, b2, *, tile_b=None, max_tile_b=2048,
                out_dtype=jnp.bfloat16):
    B, D_in = x.shape
    D_in_w, H = w1.shape
    H2, D_out = w2.shape
    assert D_in_w == D_in and H2 == H and b1.shape == (H,) and b2.shape == (D_out,)

    # --- batch tile selection ------------------------------------------------
    if tile_b is None:
        # Aim for >= 4 grid steps at large B (two TensorCores on v7x each get a
        # pipelined >=2-step loop), capped for VMEM / pipelining.
        tile_b = min(max_tile_b, _round_up(_cdiv(B, 4), SUBLANE_BF16))
        tile_b = max(tile_b, SUBLANE_BF16)
    assert tile_b % SUBLANE_BF16 == 0, "tile_b must be a multiple of 16"

    # --- input: only pad/copy x when the batch is ragged ----------------------
    if B % tile_b == 0:
        x_in, B_pad = x, B                       # no extra HBM pass over x
    else:
        B_pad = _round_up(B, tile_b)
        x_in = jnp.zeros((B_pad, D_in), x.dtype).at[:B, :].set(x)

    # --- resident operands (bf16 MXU weights, f32 biases) ---------------------
    w1_bf = w1.astype(jnp.bfloat16)
    w2_bf = w2.astype(jnp.bfloat16)
    b1_2d = b1.reshape(1, H).astype(jnp.float32)
    b2_2d = b2.reshape(1, D_out).astype(jnp.float32)

    grid = (B_pad // tile_b,)

    # --- VMEM budget from buffer math, clamped for v7x (64 MiB physical) ------
    x_isz = jnp.dtype(x.dtype).itemsize
    o_isz = jnp.dtype(out_dtype).itemsize
    vmem_bytes = (
        2 * tile_b * D_in * x_isz        # x tiles, double-buffered
        + 2 * tile_b * D_out * o_isz     # out tiles, double-buffered
        + D_in * H * 2                   # W1 (resident, bf16)
        + H * D_out * 2                  # W2 (resident, bf16)
        + (H + D_out) * 4                # biases (f32)
        + tile_b * H * (4 + 4 + 2)       # f32 h, relu temp, bf16 h (generous)
    )
    vmem_limit = int(min(max(4 * vmem_bytes, 16 << 20), 48 << 20))

    out_p = pl.pallas_call(
        mlp_kernel,
        out_shape=jax.ShapeDtypeStruct((B_pad, D_out), out_dtype),
        grid_spec=pltpu.PrefetchScalarGridSpec(
            num_scalar_prefetch=0,
            grid=grid,
            in_specs=[
                pl.BlockSpec((tile_b, D_in), lambda i: (i, 0)),   # streamed x tile
                pl.BlockSpec((D_in, H),      lambda i: (0, 0)),   # W1 (resident)
                pl.BlockSpec((1, H),         lambda i: (0, 0)),   # b1
                pl.BlockSpec((H, D_out),     lambda i: (0, 0)),   # W2 (resident)
                pl.BlockSpec((1, D_out),     lambda i: (0, 0)),   # b2
            ],
            out_specs=pl.BlockSpec((tile_b, D_out), lambda i: (i, 0)),
        ),
        compiler_params=pltpu.CompilerParams(
            dimension_semantics=("parallel",),   # batch axis shards across TCs
            vmem_limit_bytes=vmem_limit),
    )(x_in, w1_bf, b1_2d, w2_bf, b2_2d)

    # strip batch padding only (output feature dim was never padded)
    return out_p if B_pad == B else out_p[:B, :]


if __name__ == "__main__":
    # Small shapes consistent with the module: input_size=32, hidden=128, output_size=16.
    # NOTE: at this size the kernel is fixed-overhead bound; the tiling / bf16 /
    # un-padded-output choices pay off for large serving batches (B in the thousands).
    B, D_in, H, D_out = 8, 32, 128, 16

    key = jax.random.PRNGKey(0)
    kx, k1, k2, k3, k4 = jax.random.split(key, 5)

    x  = jax.random.normal(kx, (B, D_in), dtype=jnp.float32)
    w1 = jax.random.normal(k1, (D_in, H), dtype=jnp.float32) * (1.0 / jnp.sqrt(D_in))
    b1 = jax.random.normal(k2, (H,), dtype=jnp.float32) * 0.01
    w2 = jax.random.normal(k3, (H, D_out), dtype=jnp.float32) * (1.0 / jnp.sqrt(H))
    b2 = jax.random.normal(k4, (D_out,), dtype=jnp.float32) * 0.01

    out = mlp_forward(x, w1, b1, w2, b2)
    jax.block_until_ready(out)
    assert out.shape == (B, D_out)
    out_f32 = out.astype(jnp.float32)

    # Reference with matching mixed precision (bf16 MXU operands, f32 accum).
    h_ref = jnp.dot(x.astype(jnp.bfloat16), w1.astype(jnp.bfloat16),
                    preferred_element_type=jnp.float32) + b1
    h_ref = jnp.maximum(h_ref, 0.0)
    ref = jnp.dot(h_ref.astype(jnp.bfloat16), w2.astype(jnp.bfloat16),
                  preferred_element_type=jnp.float32) + b2
    assert jnp.allclose(out_f32, ref, atol=2e-2, rtol=2e-2), \
        f"max abs err {jnp.max(jnp.abs(out_f32 - ref))}"

    # Sanity vs. full-f32 math (bf16 rounding tolerance).
    ref_f32 = jnp.maximum(x @ w1 + b1, 0.0) @ w2 + b2
    assert jnp.allclose(out_f32, ref_f32, atol=7e-2, rtol=7e-2), \
        f"max abs err vs f32 {jnp.max(jnp.abs(out_f32 - ref_f32))}"

    print("KERNEL_OK")
</pallas_src>

<mosaic_0001>
module attributes {stable_mosaic.version = 11 : i64} {
  func.func @mlp_kernel(%arg0: i32, %arg1: memref<16x32xf32, #tpu.memory_space<vmem>>, %arg2: memref<32x128xbf16, #tpu.memory_space<vmem>>, %arg3: memref<1x128xf32, #tpu.memory_space<vmem>>, %arg4: memref<128x16xbf16, #tpu.memory_space<vmem>>, %arg5: memref<1x16xf32, #tpu.memory_space<vmem>>, %arg6: memref<16x16xbf16, #tpu.memory_space<vmem>>) attributes {dimension_semantics = [#tpu.dimension_semantics<parallel>], iteration_bounds = array<i64: 1>, scalar_prefetch = 0 : i64, scratch_operands = 0 : i64, tpu.core_type = #tpu.core_type<tc>, window_params = [{transform_indices = @transform_0, window_bounds = array<i64: 16, 32>}, {pipeline_mode = #tpu.pipeline_mode<synchronous>, transform_indices = @transform_1, window_bounds = array<i64: 32, 128>}, {pipeline_mode = #tpu.pipeline_mode<synchronous>, transform_indices = @transform_2, window_bounds = array<i64: 1, 128>}, {pipeline_mode = #tpu.pipeline_mode<synchronous>, transform_indices = @transform_3, window_bounds = array<i64: 128, 16>}, {pipeline_mode = #tpu.pipeline_mode<synchronous>, transform_indices = @transform_4, window_bounds = array<i64: 1, 16>}, {transform_indices = @transform_5, window_bounds = array<i64: 16, 16>}]} {
    %c0 = arith.constant 0 : index
    %c0_0 = arith.constant 0 : index
    %0 = vector.load %arg1[%c0, %c0_0] : memref<16x32xf32, #tpu.memory_space<vmem>>, vector<16x32xf32>
    %1 = arith.truncf %0 : vector<16x32xf32> to vector<16x32xbf16>
    %c0_1 = arith.constant 0 : index
    %c0_2 = arith.constant 0 : index
    %2 = vector.load %arg2[%c0_1, %c0_2] : memref<32x128xbf16, #tpu.memory_space<vmem>>, vector<32x128xbf16>
    %cst = arith.constant dense<0.000000e+00> : vector<16x128xf32>
    %3 = tpu.matmul %1, %2, %cst {dimension_numbers = #tpu.dot_dimension_numbers<[1], [0], [0], [1], [0, 0, 1, 1], [], []>} : vector<16x32xbf16>, vector<32x128xbf16>, vector<16x128xf32> -> vector<16x128xf32>
    %c0_3 = arith.constant 0 : index
    %c0_4 = arith.constant 0 : index
    %4 = vector.load %arg3[%c0_3, %c0_4] : memref<1x128xf32, #tpu.memory_space<vmem>>, vector<1x128xf32>
    %5 = vector.broadcast %4 : vector<1x128xf32> to vector<16x128xf32>
    %6 = arith.addf %3, %5 : vector<16x128xf32>
    %cst_5 = arith.constant 0.000000e+00 : f32
    %7 = vector.broadcast %cst_5 : f32 to vector<16x128xf32>
    %8 = arith.maximumf %6, %7 : vector<16x128xf32>
    %9 = arith.truncf %8 : vector<16x128xf32> to vector<16x128xbf16>
    %c0_6 = arith.constant 0 : index
    %c0_7 = arith.constant 0 : index
    %10 = vector.load %arg4[%c0_6, %c0_7] : memref<128x16xbf16, #tpu.memory_space<vmem>>, vector<128x16xbf16>
    %cst_8 = arith.constant dense<0.000000e+00> : vector<16x16xf32>
    %11 = tpu.matmul %9, %10, %cst_8 {dimension_numbers = #tpu.dot_dimension_numbers<[1], [0], [0], [1], [0, 0, 1, 1], [], []>} : vector<16x128xbf16>, vector<128x16xbf16>, vector<16x16xf32> -> vector<16x16xf32>
    %c0_9 = arith.constant 0 : index
    %c0_10 = arith.constant 0 : index
    %12 = vector.load %arg5[%c0_9, %c0_10] : memref<1x16xf32, #tpu.memory_space<vmem>>, vector<1x16xf32>
    %13 = vector.broadcast %12 : vector<1x16xf32> to vector<16x16xf32>
    %14 = arith.addf %11, %13 : vector<16x16xf32>
    %15 = arith.truncf %14 : vector<16x16xf32> to vector<16x16xbf16>
    %c0_11 = arith.constant 0 : index
    %c0_12 = arith.constant 0 : index
    %16 = vector.load %arg6[%c0_11, %c0_12] : memref<16x16xbf16, #tpu.memory_space<vmem>>, vector<16x16xbf16>
    tpu.vector_store %arg6[%c0_11, %c0_12], %15 {strides = array<i32>} : memref<16x16xbf16, #tpu.memory_space<vmem>>, vector<16x16xbf16>,
    return
  }
  func.func @transform_0(%arg0: i32) -> (i32, i32) {
    %c0_i32 = arith.constant 0 : i32
    %c0_i32_0 = arith.constant 0 : i32
    return %arg0, %c0_i32 : i32, i32
  }
  func.func @transform_1(%arg0: i32) -> (i32, i32) {
    %c0_i32 = arith.constant 0 : i32
    %c0_i32_0 = arith.constant 0 : i32
    %c0_i32_1 = arith.constant 0 : i32
    return %c0_i32, %c0_i32_0 : i32, i32
  }
  func.func @transform_2(%arg0: i32) -> (i32, i32) {
    %c0_i32 = arith.constant 0 : i32
    %c0_i32_0 = arith.constant 0 : i32
    %c0_i32_1 = arith.constant 0 : i32
    return %c0_i32, %c0_i32_0 : i32, i32
  }
  func.func @transform_3(%arg0: i32) -> (i32, i32) {
    %c0_i32 = arith.constant 0 : i32
    %c0_i32_0 = arith.constant 0 : i32
    %c0_i32_1 = arith.constant 0 : i32
    return %c0_i32, %c0_i32_0 : i32, i32
  }
  func.func @transform_4(%arg0: i32) -> (i32, i32) {
    %c0_i32 = arith.constant 0 : i32
    %c0_i32_0 = arith.constant 0 : i32
    %c0_i32_1 = arith.constant 0 : i32
    return %c0_i32, %c0_i32_0 : i32, i32
  }
  func.func @transform_5(%arg0: i32) -> (i32, i32) {
    %c0_i32 = arith.constant 0 : i32
    %c0_i32_0 = arith.constant 0 : i32
    return %arg0, %c0_i32 : i32, i32
  }
}

</mosaic_0001>

<bundles_post_ra>
// kernel: tpu_custom_call.1
= control target key start
LH: loop header
LB: loop body
LE: loop exit
PB: predicated region body
PF: predicated region fallthrough
CT: control target
= control target key end

     0   :  { %s331_s0 = inlined_call_operand.vmem [shape: f32[16,32], index: 0, kind: input, shape index: {}]   ;;  %s332_s1 = inlined_call_operand.vmem [shape: bf16[32,128], index: 1, kind: input, shape index: {}]   ;;  %s333_s2 = inlined_call_operand.vmem [shape: f32[1,128], index: 2, kind: input, shape index: {}]   ;;  %s334_s3 = inlined_call_operand.vmem [shape: bf16[128,16], index: 3, kind: input, shape index: {}]   ;;  %s335_s4 = inlined_call_operand.vmem [shape: f32[1,16], index: 4, kind: input, shape index: {}]   ;;  %s336_s5 = inlined_call_operand.hbm [shape: bf16[16,16], index: 5, kind: output, shape index: {}]  }
   0x1   :  { %v213_v0 = vld [vmem:[%s332_s1 + $0x8] sm:$0xff]  ;;  %v212_v1 = vld [vmem:[%s332_s1] sm:$0xff]  ;;  %v221_v2 = vld [vmem:[%s334_s3 + $0x38] sm:$0xff] }
   0x2   :  { %55 = vmatpush.bf16.msra.mxu0 %v213_v0  ;;  %v22_v3 = vld [vmem:[%s331_s0] sm:$0xff]  ;;  %v23_v4 = vld [vmem:[%s331_s0 + $0x8] sm:$0xff]  ;;  %134 = vmatpush.bf16.msra.mxu1 %v221_v2  ;;  %v220_v5 = vld [vmem:[%s334_s3 + $0x30] sm:$0xff] }
   0x3   :  { %10 = vsyncpa [#allocation3], 0  ;;  %v24_v6 = vpack.c.bf16 %v23_v4, %v22_v3  ;;  %vm45_vm0 = vcmask 261120   ;;  %v219_v7 = vld [vmem:[%s334_s3 + $0x28] sm:$0xff]  ;;  %v218_v8 = vld [vmem:[%s334_s3 + $0x20] sm:$0xff]  ;;  %vm150_vm1 = vcmask 125952  }
   0x4   :  { %v217_v9 = vld [vmem:[%s334_s3 + $0x18] sm:$0xff]  ;;  %v216_v10 = vld [vmem:[%s334_s3 + $0x10] sm:$0xff]  ;;  %v215_v11 = vld [vmem:[%s334_s3 + $0x8] sm:$0xff]  ;;  %s159_s21 = sshll.u32 %s336_s5, 4  ;;  %s254_s22 = smov 64   ;;  %s160_s21 = int_to_ptr.hbm [resolvable:$true] %s159_s21 }
   0x5   :  { %v214_v12 = vld [vmem:[%s334_s3] sm:$0xff]  ;;  %s253_s3 = smov [#allocation2]   ;;  %s255_s23 = smov 4  }
   0x6   :  { %56 = vmatpush.bf16.msra.mxu0 %v212_v1  ;;  %135 = vmatpush.bf16.msra.mxu1 %v220_v5  ;;  %v225_v14 = vld [vmem:[%s333_s2] ss:$0 sm:$0xff]  ;;  %s157_s19 = sshll.u32 %s253_s3, 4  ;;  %s158_s19 = int_to_ptr.vmem [resolvable:$true] %s157_s19 }
   0x7   :  { %v226_v21 = vld [vmem:[%s335_s4] ss:$0 sm:$0xff] }
   0x9   :  { %179 = vmatmul.msk.bf16.vlgmr.msra.gmra.mxu0 %vm45_vm0, %v24_v6 }
   0xa   :  { %136 = vmatpush.bf16.msra.mxu1 %v219_v7 }
   0xe   :  { %137 = vmatpush.bf16.msra.mxu1 %v218_v8 }
  0x12   :  { %138 = vmatpush.bf16.msra.mxu1 %v217_v9 }
  0x16   :  { %139 = vmatpush.bf16.msra.mxu1 %v216_v10 }
  0x1a   :  { %140 = vmatpush.bf16.msra.mxu1 %v215_v11 }
  0x1e   :  { %141 = vmatpush.bf16.msra.mxu1 %v214_v12 }
  0x86   :  { %v58_v13 = vpop.f32.mrf.mxu0 }
  0x87   :  { %v59_v15 = vadd.f32 %v225_v14, %v58_v13 }
  0x89   :  { %v63_v18 = vmax.f32 %v59_v15, 0.0 }
  0x8e   :  { %v60_v16 = vpop.f32.mrf.mxu0 }
  0x8f   :  { %v61_v17 = vadd.f32 %v225_v14, %v60_v16 }
  0x91   :  { %v64_v19 = vmax.f32 %v61_v17, 0.0 }
  0x93   :  { %v65_v20 = vpack.c.bf16 %v64_v19, %v63_v18 }
  0x95   :  { %142 = vmatmul.bf16.vlgmr.msra.gmra.mxu1 %v65_v20 }
 0x112   :  { %v143_v22 = vpop.f32.mrf.mxu1 }
 0x113   :  { %v144_v23 = vadd.f32 %v226_v21, %v143_v22 }
 0x115   :  { %v148_v24 = vpack.c.bf16 %v144_v23, %v144_v23 }
 0x117   :  { %151 = vst.msk [vmem:[#allocation2] sm:$0xf] %vm150_vm1, %v148_v24 }
 0x11a   :  { %v145_v25 = vpop.f32.mrf.mxu1 }
 0x11b   :  { %v146_v26 = vadd.f32 %v226_v21, %v145_v25 }
 0x11d   :  { %v149_v27 = vpack.c.bf16 %v146_v26, %v146_v26 }
 0x11f   :  { %152 = vst.msk [vmem:[#allocation2 + $0x4] sm:$0xf] %vm150_vm1, %v149_v27 }
 0x120   :  { %165 = dma.vmem_to_hbm [thread:$0]  %s158_s19, 128, %s160_s21, [#allocation3], %s254_s22, %s254_s22, %s255_s23  }
 0x121   :  { %251 = dma.done.wait [#allocation3], 128  }
 0x122   :  { %252 = vsyncadd [#allocation3], 4294967168 }
 0x123   :  { %170 = vsyncpa [#allocation3], 1 }

</bundles_post_ra>
